<compile_context>
chip_gen: v5e
topology: v5e:2x2
jax: 0.10.0
libtpu: 0.0.40
codegen_flags: <defaults>
</compile_context>

<pallas_src>
import functools

import jax
import jax.numpy as jnp
from jax.experimental import pallas as pl
from jax.experimental.pallas import tpu as pltpu


def _round_up(x, m):
    return ((x + m - 1) // m) * m


def _embed_gather_kernel(wids_ref, fids_ref,         # scalar-prefetch ids (SMEM)
                         wtbl_hbm, ftbl_hbm,         # embedding tables (raw HBM refs)
                         sum_ref, feat_ref,          # (tile_n, E) output tiles (VMEM)
                         wbuf, fbuf, sems,           # scratch: gather buffers + DMA sems
                         *, tile_n):
    base = pl.program_id(0) * tile_n

    # Issue all row-gather DMAs for this token tile; they are all in flight
    # concurrently (word rows on sems[0], feat rows on sems[1]).
    @pl.loop(0, tile_n)
    def _start(t):
        wid = wids_ref[base + t]
        fid = fids_ref[base + t]
        pltpu.make_async_copy(wtbl_hbm.at[wid], wbuf.at[t], sems.at[0]).start()
        pltpu.make_async_copy(ftbl_hbm.at[fid], fbuf.at[t], sems.at[1]).start()

    # Wait for all of them (descriptor rebuilt only for byte accounting).
    @pl.loop(0, tile_n)
    def _wait(t):
        pltpu.make_async_copy(wtbl_hbm.at[0], wbuf.at[0], sems.at[0]).wait()
        pltpu.make_async_copy(ftbl_hbm.at[0], fbuf.at[0], sems.at[1]).wait()

    # TODO(synk): IndependentDropout is identity in eval mode; training-mode
    # stochastic dropout/rescaling is not implemented here.
    femb = fbuf[...]
    feat_ref[...] = femb.astype(feat_ref.dtype)
    sum_ref[...] = (wbuf[...] + femb).astype(sum_ref.dtype)


def embedding_layer_forward(words, feats, word_table, feat_table,
                            pad_index=0, tile_n=256):
    """Returns (word_embed + feat_embed, feat_embed, mask, seq_len)."""
    B, S = words.shape
    N = B * S
    Vw, E = word_table.shape
    Vf, Ef = feat_table.shape
    assert E == Ef, "n_embed must equal n_feat_embed (they are summed)"

    out_dtype = word_table.dtype

    # Mask is a trivial elementwise compare; keep it out of the kernel so the
    # kernel only writes lane-dense (tile_n, E) slabs.
    mask = words != pad_index

    # Clamp ids so the gather DMAs are always in range.
    # TODO(synk): PyTorch raises on out-of-range ids; here they are clamped.
    wids = jnp.clip(words.reshape(N).astype(jnp.int32), 0, Vw - 1)
    fids = jnp.clip(feats.reshape(N).astype(jnp.int32), 0, Vf - 1)

    # Pick a token-tile size: multiple of 8, no larger than the (padded) token
    # count; pad ids (with valid id 0) so no divisibility assert is needed.
    tile_n = max(8, min(int(tile_n), _round_up(N, 8)))
    tile_n = _round_up(tile_n, 8)
    n_pad = _round_up(N, tile_n)
    if n_pad != N:
        wids = jnp.pad(wids, (0, n_pad - N))
        fids = jnp.pad(fids, (0, n_pad - N))
    num_tiles = n_pad // tile_n

    kernel = functools.partial(_embed_gather_kernel, tile_n=tile_n)

    wplusf, femb = pl.pallas_call(
        kernel,
        grid_spec=pltpu.PrefetchScalarGridSpec(
            num_scalar_prefetch=2,                 # wids, fids -> SMEM
            grid=(num_tiles,),
            in_specs=[
                pl.BlockSpec(memory_space=pl.ANY),   # word table stays in HBM
                pl.BlockSpec(memory_space=pl.ANY),   # feat table stays in HBM
            ],
            out_specs=[
                pl.BlockSpec((tile_n, E), lambda i, _w, _f: (i, 0)),  # word+feat
                pl.BlockSpec((tile_n, E), lambda i, _w, _f: (i, 0)),  # feat
            ],
            scratch_shapes=[
                pltpu.VMEM((tile_n, E), word_table.dtype),   # gathered word rows
                pltpu.VMEM((tile_n, E), feat_table.dtype),   # gathered feat rows
                pltpu.SemaphoreType.DMA((2,)),
            ],
        ),
        out_shape=[
            jax.ShapeDtypeStruct((n_pad, E), out_dtype),
            jax.ShapeDtypeStruct((n_pad, E), out_dtype),
        ],
        compiler_params=pltpu.CompilerParams(
            dimension_semantics=("parallel",)),
    )(wids, fids, word_table, feat_table)

    word_embed = wplusf[:N].reshape(B, S, E)
    feat_embed = femb[:N].reshape(B, S, E)
    return word_embed, feat_embed, mask, S


if __name__ == "__main__":
    # Small, deterministic setup consistent with the module's __init__
    # (feat='tag' branch; n_embed == n_feat_embed because they are added).
    B, S = 2, 8
    n_words, n_feats = 64, 32
    n_embed = n_feat_embed = 128
    pad_index = 0

    key = jax.random.PRNGKey(0)
    k_wtbl, k_ftbl, k_words, k_feats = jax.random.split(key, 4)

    word_table = jax.random.normal(k_wtbl, (n_words, n_embed), dtype=jnp.float32)
    feat_table = jax.random.normal(k_ftbl, (n_feats, n_feat_embed), dtype=jnp.float32)

    words = jax.random.randint(k_words, (B, S), 0, n_words, dtype=jnp.int32)
    words = words.at[:, -2:].set(pad_index)   # force some padding positions
    feats = jax.random.randint(k_feats, (B, S), 0, n_feats, dtype=jnp.int32)

    word_embed, feat_embed, mask, seq_len = embedding_layer_forward(
        words, feats, word_table, feat_table, pad_index=pad_index)
    jax.block_until_ready((word_embed, feat_embed, mask))

    # Reference check against plain-JAX gather semantics.
    ref_w = word_table[words]
    ref_f = feat_table[feats]
    ref_sum = ref_w + ref_f
    ref_mask = words != pad_index
    assert word_embed.shape == (B, S, n_embed)
    assert feat_embed.shape == (B, S, n_feat_embed)
    assert mask.shape == (B, S)
    assert seq_len == S
    assert jnp.allclose(word_embed, ref_sum, atol=1e-5)
    assert jnp.allclose(feat_embed, ref_f, atol=1e-5)
    assert bool(jnp.all(mask == ref_mask))

    print("KERNEL_OK")
</pallas_src>

<mosaic_0001>
module attributes {stable_mosaic.version = 11 : i64} {
  func.func @_embed_gather_kernel(%arg0: i32, %arg1: memref<16xi32, #tpu.memory_space<smem>>, %arg2: memref<16xi32, #tpu.memory_space<smem>>, %arg3: memref<64x128xf32, #tpu.memory_space<any>>, %arg4: memref<32x128xf32, #tpu.memory_space<any>>, %arg5: memref<16x128xf32, #tpu.memory_space<vmem>>, %arg6: memref<16x128xf32, #tpu.memory_space<vmem>>, %arg7: memref<16x128xf32, #tpu.memory_space<vmem>>, %arg8: memref<16x128xf32, #tpu.memory_space<vmem>>, %arg9: memref<2x!tpu.dma_semaphore, #tpu.memory_space<semaphore_mem>>) attributes {dimension_semantics = [#tpu.dimension_semantics<parallel>], iteration_bounds = array<i64: 1>, scalar_prefetch = 2 : i64, scratch_operands = 3 : i64, tpu.core_type = #tpu.core_type<tc>, window_params = [{}, {}, {transform_indices = @transform_2, window_bounds = array<i64: 16, 128>}, {transform_indices = @transform_3, window_bounds = array<i64: 16, 128>}]} {
    %c16_i32 = arith.constant 16 : i32
    %0 = arith.muli %arg0, %c16_i32 : i32
    %c0_i32 = arith.constant 0 : i32
    %c16_i32_0 = arith.constant 16 : i32
    %1 = arith.addi %c0_i32, %c16_i32_0 : i32
    %c1_i32 = arith.constant 1 : i32
    scf.for %arg10 = %c0_i32 to %1 step %c1_i32  : i32 {
      %c1_i32_12 = arith.constant 1 : i32
      %8 = arith.muli %arg10, %c1_i32_12 : i32
      %c0_i32_13 = arith.constant 0 : i32
      %9 = arith.addi %c0_i32_13, %8 : i32
      %10 = arith.addi %0, %9 : i32
      %11 = arith.index_cast %10 : i32 to index
      %12 = memref.load %arg1[%11] : memref<16xi32, #tpu.memory_space<smem>>
      %13 = arith.addi %0, %9 : i32
      %14 = arith.index_cast %13 : i32 to index
      %15 = memref.load %arg2[%14] : memref<16xi32, #tpu.memory_space<smem>>
      %c0_i32_14 = arith.constant 0 : i32
      %c0_i32_15 = arith.constant 0 : i32
      %16 = tpu.memref_slice %arg3[%12, %c0_i32_15] : memref<64x128xf32, #tpu.memory_space<any>> -> memref<1x128xf32, #tpu.memory_space<any>>
      %17 = tpu.memref_squeeze %16 : memref<1x128xf32, #tpu.memory_space<any>> -> memref<128xf32, #tpu.memory_space<any>>
      %c0_i32_16 = arith.constant 0 : i32
      %18 = tpu.memref_slice %arg7[%9, %c0_i32_16] : memref<16x128xf32, #tpu.memory_space<vmem>> -> memref<1x128xf32, #tpu.memory_space<vmem>>
      %19 = tpu.memref_squeeze %18 : memref<1x128xf32, #tpu.memory_space<vmem>> -> memref<128xf32, #tpu.memory_space<vmem>>
      %20 = tpu.memref_slice %arg9[%c0_i32_14] : memref<2x!tpu.dma_semaphore, #tpu.memory_space<semaphore_mem>> -> memref<1x!tpu.dma_semaphore, #tpu.memory_space<semaphore_mem>>
      %21 = tpu.memref_squeeze %20 : memref<1x!tpu.dma_semaphore, #tpu.memory_space<semaphore_mem>> -> memref<!tpu.dma_semaphore, #tpu.memory_space<semaphore_mem>>
      tpu.enqueue_dma source(%17 : memref<128xf32, #tpu.memory_space<any>>) target(%19 : memref<128xf32, #tpu.memory_space<vmem>>) target_semaphore(%21 : memref<!tpu.dma_semaphore, #tpu.memory_space<semaphore_mem>>)
      %c1_i32_17 = arith.constant 1 : i32
      %c0_i32_18 = arith.constant 0 : i32
      %22 = tpu.memref_slice %arg4[%15, %c0_i32_18] : memref<32x128xf32, #tpu.memory_space<any>> -> memref<1x128xf32, #tpu.memory_space<any>>
      %23 = tpu.memref_squeeze %22 : memref<1x128xf32, #tpu.memory_space<any>> -> memref<128xf32, #tpu.memory_space<any>>
      %c0_i32_19 = arith.constant 0 : i32
      %24 = tpu.memref_slice %arg8[%9, %c0_i32_19] : memref<16x128xf32, #tpu.memory_space<vmem>> -> memref<1x128xf32, #tpu.memory_space<vmem>>
      %25 = tpu.memref_squeeze %24 : memref<1x128xf32, #tpu.memory_space<vmem>> -> memref<128xf32, #tpu.memory_space<vmem>>
      %26 = tpu.memref_slice %arg9[%c1_i32_17] : memref<2x!tpu.dma_semaphore, #tpu.memory_space<semaphore_mem>> -> memref<1x!tpu.dma_semaphore, #tpu.memory_space<semaphore_mem>>
      %27 = tpu.memref_squeeze %26 : memref<1x!tpu.dma_semaphore, #tpu.memory_space<semaphore_mem>> -> memref<!tpu.dma_semaphore, #tpu.memory_space<semaphore_mem>>
      tpu.enqueue_dma source(%23 : memref<128xf32, #tpu.memory_space<any>>) target(%25 : memref<128xf32, #tpu.memory_space<vmem>>) target_semaphore(%27 : memref<!tpu.dma_semaphore, #tpu.memory_space<semaphore_mem>>)
    }
    %c16_i32_1 = arith.constant 16 : i32
    %c0_i32_2 = arith.constant 0 : i32
    %c16_i32_3 = arith.constant 16 : i32
    %2 = arith.addi %c0_i32_2, %c16_i32_3 : i32
    %c1_i32_4 = arith.constant 1 : i32
    scf.for %arg10 = %c0_i32_2 to %2 step %c1_i32_4  : i32 {
      %c0_i32_12 = arith.constant 0 : i32
      %c0_i32_13 = arith.constant 0 : i32
      %c0_i32_14 = arith.constant 0 : i32
      %c0_i32_15 = arith.constant 0 : i32
      %8 = tpu.memref_slice %arg3[%c0_i32_12, %c0_i32_15] : memref<64x128xf32, #tpu.memory_space<any>> -> memref<1x128xf32, #tpu.memory_space<any>>
      %9 = tpu.memref_squeeze %8 : memref<1x128xf32, #tpu.memory_space<any>> -> memref<128xf32, #tpu.memory_space<any>>
      %c0_i32_16 = arith.constant 0 : i32
      %10 = tpu.memref_slice %arg7[%c0_i32_13, %c0_i32_16] : memref<16x128xf32, #tpu.memory_space<vmem>> -> memref<1x128xf32, #tpu.memory_space<vmem>>
      %11 = tpu.memref_squeeze %10 : memref<1x128xf32, #tpu.memory_space<vmem>> -> memref<128xf32, #tpu.memory_space<vmem>>
      %12 = tpu.memref_slice %arg9[%c0_i32_14] : memref<2x!tpu.dma_semaphore, #tpu.memory_space<semaphore_mem>> -> memref<1x!tpu.dma_semaphore, #tpu.memory_space<semaphore_mem>>
      %13 = tpu.memref_squeeze %12 : memref<1x!tpu.dma_semaphore, #tpu.memory_space<semaphore_mem>> -> memref<!tpu.dma_semaphore, #tpu.memory_space<semaphore_mem>>
      tpu.wait_dma2 semaphore(%13 : memref<!tpu.dma_semaphore, #tpu.memory_space<semaphore_mem>>) src(%9 : memref<128xf32, #tpu.memory_space<any>>) dst(%11 : memref<128xf32, #tpu.memory_space<vmem>>)
      %c0_i32_17 = arith.constant 0 : i32
      %c0_i32_18 = arith.constant 0 : i32
      %c1_i32_19 = arith.constant 1 : i32
      %c0_i32_20 = arith.constant 0 : i32
      %14 = tpu.memref_slice %arg4[%c0_i32_17, %c0_i32_20] : memref<32x128xf32, #tpu.memory_space<any>> -> memref<1x128xf32, #tpu.memory_space<any>>
      %15 = tpu.memref_squeeze %14 : memref<1x128xf32, #tpu.memory_space<any>> -> memref<128xf32, #tpu.memory_space<any>>
      %c0_i32_21 = arith.constant 0 : i32
      %16 = tpu.memref_slice %arg8[%c0_i32_18, %c0_i32_21] : memref<16x128xf32, #tpu.memory_space<vmem>> -> memref<1x128xf32, #tpu.memory_space<vmem>>
      %17 = tpu.memref_squeeze %16 : memref<1x128xf32, #tpu.memory_space<vmem>> -> memref<128xf32, #tpu.memory_space<vmem>>
      %18 = tpu.memref_slice %arg9[%c1_i32_19] : memref<2x!tpu.dma_semaphore, #tpu.memory_space<semaphore_mem>> -> memref<1x!tpu.dma_semaphore, #tpu.memory_space<semaphore_mem>>
      %19 = tpu.memref_squeeze %18 : memref<1x!tpu.dma_semaphore, #tpu.memory_space<semaphore_mem>> -> memref<!tpu.dma_semaphore, #tpu.memory_space<semaphore_mem>>
      tpu.wait_dma2 semaphore(%19 : memref<!tpu.dma_semaphore, #tpu.memory_space<semaphore_mem>>) src(%15 : memref<128xf32, #tpu.memory_space<any>>) dst(%17 : memref<128xf32, #tpu.memory_space<vmem>>)
    }
    %c0 = arith.constant 0 : index
    %c0_5 = arith.constant 0 : index
    %3 = vector.load %arg8[%c0, %c0_5] : memref<16x128xf32, #tpu.memory_space<vmem>>, vector<16x128xf32>
    %c0_6 = arith.constant 0 : index
    %c0_7 = arith.constant 0 : index
    %4 = vector.load %arg6[%c0_6, %c0_7] : memref<16x128xf32, #tpu.memory_space<vmem>>, vector<16x128xf32>
    tpu.vector_store %arg6[%c0_6, %c0_7], %3 {strides = array<i32>} : memref<16x128xf32, #tpu.memory_space<vmem>>, vector<16x128xf32>,
    %c0_8 = arith.constant 0 : index
    %c0_9 = arith.constant 0 : index
    %5 = vector.load %arg7[%c0_8, %c0_9] : memref<16x128xf32, #tpu.memory_space<vmem>>, vector<16x128xf32>
    %6 = arith.addf %5, %3 : vector<16x128xf32>
    %c0_10 = arith.constant 0 : index
    %c0_11 = arith.constant 0 : index
    %7 = vector.load %arg5[%c0_10, %c0_11] : memref<16x128xf32, #tpu.memory_space<vmem>>, vector<16x128xf32>
    tpu.vector_store %arg5[%c0_10, %c0_11], %6 {strides = array<i32>} : memref<16x128xf32, #tpu.memory_space<vmem>>, vector<16x128xf32>,
    return
  }
  func.func @transform_2(%arg0: i32, %arg1: memref<16xi32, #tpu.memory_space<smem>>, %arg2: memref<16xi32, #tpu.memory_space<smem>>) -> (i32, i32) {
    %c0_i32 = arith.constant 0 : i32
    %c0_i32_0 = arith.constant 0 : i32
    return %arg0, %c0_i32 : i32, i32
  }
  func.func @transform_3(%arg0: i32, %arg1: memref<16xi32, #tpu.memory_space<smem>>, %arg2: memref<16xi32, #tpu.memory_space<smem>>) -> (i32, i32) {
    %c0_i32 = arith.constant 0 : i32
    %c0_i32_0 = arith.constant 0 : i32
    return %arg0, %c0_i32 : i32, i32
  }
}

</mosaic_0001>

<bundles_post_ra>
// kernel: tpu_custom_call.1
= control target key start
LH: loop header
LB: loop body
LE: loop exit
PB: predicated region body
PF: predicated region fallthrough
CT: control target
= control target key end

     0   :  { %s321_s24 = smov [#allocation6]   ;;  %s322_s25 = smov [#allocation7]   ;;  %s414_s0 = inlined_call_operand.hbm [shape: s32[16], index: 0, kind: input, shape index: {}]   ;;  %s415_s2 = inlined_call_operand.hbm [shape: f32[64,128], index: 2, kind: input, shape index: {}]   ;;  %s416_s3 = inlined_call_operand.hbm [shape: f32[32,128], index: 3, kind: input, shape index: {}]   ;;  %s417_s4 = inlined_call_operand.hbm [shape: f32[16,128], index: 4, kind: output, shape index: {0}]   ;;  %s418_s5 = inlined_call_operand.hbm [shape: f32[16,128], index: 5, kind: output, shape index: {1}]   ;;  %s419_s1 = inlined_call_operand.hbm [shape: s32[16], index: 1, kind: input, shape index: {}]  }
   0x1   :  { %s12_s20 = sshll.u32 %s414_s0, 4  ;;  %s17_s23 = sshll.u32 %s419_s1, 4  ;;  %s13_s20 = int_to_ptr.hbm [resolvable:$true] %s12_s20  ;;  %s18_s23 = int_to_ptr.hbm [resolvable:$true] %s17_s23 }
   0x2   :  { %15 = dma.hbm_to_smem %s13_s20, 16, %s321_s24, [#allocation5] }
   0x3   :  { %20 = dma.hbm_to_smem %s18_s23, 16, %s322_s25, [#allocation5] }
   0x4   :  { %303 = dma.done.wait [#allocation5], 32 }
   0x5   :  { %304 = vsyncadd [#allocation5], 4294967264 }
   0x6   :  { %23 = sfence }
   0x7   :  { %24 = vsyncpa [#allocation9], 0 }
   0x8   :  { %25 = vsyncpa [#allocation11], 0  ;;  %s365_s26 = smov 0  }
   0x9 LB: > { %s34_s0 = sld [smem:[#allocation6 + %s315_s26]]  ;;  %s37_s27 = scalar_lea.vmem [#allocation2], %s315_s26  ;;  %s315_s26 = sphi %s365_s26, %s32_s26  }
   0xa   : > { %s35_s1 = sld [smem:[#allocation7 + %s315_s26]]  ;;  %s373_s28 = sshll.u32 %s37_s27, 4  ;;  %s48_s28 = int_to_ptr.vmem [resolvable:$true] %s373_s28 }
   0xb   : > { %s52_s29 = scalar_lea.vmem [#allocation3], %s315_s26  ;;  %s203_s18 = scalar_lea.hbm %s415_s2, 64 }
   0xc   : > { %s376_s30 = sshll.u32 %s52_s29, 4  ;;  %s64_s30 = int_to_ptr.vmem [resolvable:$true] %s376_s30 }
   0xf   : > { %s36_s8 = scalar_lea.hbm %s415_s2, %s34_s0 }
  0x10   : > { %s45_s9 = sshll.u32 %s36_s8, 4  ;;  %s51_s12 = scalar_lea.hbm %s416_s3, %s35_s1  ;;  %s46_s9 = int_to_ptr.hbm [resolvable:$true] %s45_s9 }
  0x11   : > { %s386_s13 = sshll.u32 %s51_s12, 4  ;;  %s199_s14 = sshra.s32 %s46_s9, 4  ;;  %s200_s14 = int_to_ptr.hbm [resolvable:$true] %s199_s14  ;;  %s62_s13 = int_to_ptr.hbm [resolvable:$true] %s386_s13 }
  0x12   : > { %s201_s15 = scalar_lea.hbm %s200_s14, 1  ;;  %p204_p1 = scmp.lt.s32.totalorder %s200_s14, %s415_s2 }
  0x13   : > { %p202_p0 = scmp.ne.s32.totalorder %s200_s14, %s201_s15  ;;  %p205_p2 = scmp.lt.s32.totalorder %s203_s18, %s201_s15 }
  0x15   : > { %p206_p3 = por %p205_p2, %p204_p1 }
  0x17   : > { %p207_p4 = pnand %p206_p3, %p202_p0 }
  0x19   : > { %210 = shalt.err (!%p207_p4)  }
  0x1a   : > { %s211_s21 = sshra.s32 %s48_s28, 4  ;;  %s323_s23 = smov [#allocation2]   ;;  %s212_s21 = int_to_ptr.vmem [resolvable:$true] %s211_s21 }
  0x1b   : > { %s213_s22 = scalar_lea.vmem %s212_s21, 1  ;;  %s215_s24 = scalar_lea.vmem %s323_s23, 16 }
  0x1c   : > { %p214_p5 = scmp.ne.s32.totalorder %s212_s21, %s213_s22  ;;  %p216_p6 = scmp.lt.s32.totalorder %s212_s21, [#allocation2] }
  0x1d   : > { %p217_p7 = scmp.lt.s32.totalorder %s215_s24, %s213_s22 }
  0x1f   : > { %p218_p8 = por %p217_p7, %p216_p6 }
  0x21   : > { %p219_p9 = pnand %p218_p8, %p214_p5 }
  0x23   : > { %222 = shalt.err (!%p219_p9)  }
  0x24   : > { %50 = dma.hbm_to_vmem [thread:$0]  %s46_s9, 16, %s48_s28, [#allocation4] }
  0x25   : > { %s223_s25 = sshra.s32 %s62_s13, 4  ;;  %s227_s29 = scalar_lea.hbm %s416_s3, 32  ;;  %s224_s25 = int_to_ptr.hbm [resolvable:$true] %s223_s25 }
  0x26   : > { %s225_s0 = scalar_lea.hbm %s224_s25, 1  ;;  %p228_p11 = scmp.lt.s32.totalorder %s224_s25, %s416_s3 }
  0x27   : > { %p226_p10 = scmp.ne.s32.totalorder %s224_s25, %s225_s0  ;;  %p229_p12 = scmp.lt.s32.totalorder %s227_s29, %s225_s0 }
  0x29   : > { %p230_p13 = por %p229_p12, %p228_p11 }
  0x2b   : > { %p231_p0 = pnand %p230_p13, %p226_p10 }
  0x2d   : > { %234 = shalt.err (!%p231_p0)  }
  0x2e   : > { %s235_s28 = sshra.s32 %s64_s30, 4  ;;  %s324_s9 = smov [#allocation3]   ;;  %s236_s28 = int_to_ptr.vmem [resolvable:$true] %s235_s28 }
  0x2f   : > { %s237_s8 = scalar_lea.vmem %s236_s28, 1  ;;  %s239_s10 = scalar_lea.vmem %s324_s9, 16 }
  0x30   : > { %p238_p1 = scmp.ne.s32.totalorder %s236_s28, %s237_s8  ;;  %p240_p2 = scmp.lt.s32.totalorder %s236_s28, [#allocation3] }
  0x31   : > { %p241_p3 = scmp.lt.s32.totalorder %s239_s10, %s237_s8 }
  0x33   : > { %p242_p4 = por %p241_p3, %p240_p2 }
  0x35   : > { %p243_p5 = pnand %p242_p4, %p238_p1 }
  0x37   : > { %246 = shalt.err (!%p243_p5)  }
  0x38   : > { %66 = dma.hbm_to_vmem [thread:$0]  %s62_s13, 16, %s64_s30, [#allocation4 + $0x1] }
  0x39   : > { %s32_s26 = sadd.s32 1, %s315_s26  }
  0x3a   : > { %p29_p6 = scmp.ge.s32.totalorder %s32_s26, 16  }
  0x3b   :  { %s317_s11 = smov (%p29_p6), 0  }
  0x3c   :  { %31 = sbr.rel (!%p29_p6) target bundleno = 9 (0x9), region = 57 }
  0x41 LB: > { %305 = dma.done.wait [#allocation4], 16  ;;  %s319_s11 = sphi %s317_s11, %s72_s11  }
  0x42   : > { %306 = vsyncadd [#allocation4], 4294967280 }
  0x43   : > { %307 = dma.done.wait [#allocation4 + $0x1], 16 }
  0x44   : > { %308 = vsyncadd [#allocation4 + $0x1], 4294967280  ;;  %s72_s11 = sadd.s32 1, %s319_s11  }
  0x45   : > { %p69_p7 = scmp.ge.s32.totalorder %s72_s11, 16  }
  0x46   :  { %v78_v0 = vld [vmem:[#allocation3] sm:$0xff] (%p69_p7)  ;;  %v79_v1 = vld [vmem:[#allocation3 + $0x8] sm:$0xff] (%p69_p7)  ;;  %v82_v2 = vld [vmem:[#allocation2] sm:$0xff] (%p69_p7)  ;;  %s94_s26 = sshll.u32 (%p69_p7), %s417_s4, 4  ;;  %s325_s2 = smov (%p69_p7), [#allocation8]   ;;  %s95_s26 = int_to_ptr.hbm [resolvable:$true] %s94_s26 }
  0x47   :  { %71 = sbr.rel (!%p69_p7) target bundleno = 65 (0x41), region = 68  ;;  %80 = vst [vmem:[#allocation10] sm:$0xff] (%p69_p7), %v78_v0  ;;  %v84_v3 = vadd.f32 (%p69_p7), %v82_v2, %v78_v0  ;;  %v83_v4 = vld [vmem:[#allocation2 + $0x8] sm:$0xff] (%p69_p7)  ;;  %s92_s3 = sshll.u32 (%p69_p7), %s325_s2, 4  ;;  %s93_s3 = int_to_ptr.vmem [resolvable:$true] %s92_s3 }
  0x48   :  { %81 = vst [vmem:[#allocation10 + $0x8] sm:$0xff] (%p69_p7), %v79_v1  ;;  %v85_v5 = vadd.f32 (%p69_p7), %v83_v4, %v79_v1  ;;  %s326_s13 = smov (%p69_p7), [#allocation10]   ;;  %s107_s17 = sshll.u32 (%p69_p7), %s418_s5, 4  ;;  %s108_s17 = int_to_ptr.hbm [resolvable:$true] %s107_s17 }
  0x49   :  { %86 = vst [vmem:[#allocation8] sm:$0xff] (%p69_p7), %v84_v3  ;;  %s105_s14 = sshll.u32 (%p69_p7), %s326_s13, 4  ;;  %s327_s18 = smov (%p69_p7), 128   ;;  %s106_s14 = int_to_ptr.vmem [resolvable:$true] %s105_s14 }
  0x4a   :  { %87 = vst [vmem:[#allocation8 + $0x8] sm:$0xff] (%p69_p7), %v85_v5  ;;  %s328_s19 = smov (%p69_p7), 8  }
  0x4b   :  { %100 = dma.vmem_to_hbm [thread:$0]  (%p69_p7), %s93_s3, 256, %s95_s26, [#allocation9], %s327_s18, %s327_s18, %s328_s19  }
  0x4c   :  { %113 = dma.vmem_to_hbm [thread:$0]  %s106_s14, 256, %s108_s17, [#allocation11], %s327_s18, %s327_s18, %s328_s19  }
  0x4d   :  { %309 = dma.done.wait [#allocation9], 256  }
  0x4e   :  { %310 = vsyncadd [#allocation9], 4294967040 }
  0x4f   :  { %311 = dma.done.wait [#allocation11], 256  }
  0x50   :  { %312 = vsyncadd [#allocation11], 4294967040 }
  0x51   :  { %122 = vsyncpa [#allocation9], 1 }
  0x52   :  { %123 = vsyncpa [#allocation11], 1 }
  0x53   :  { %124 = vsyncmov [#allocation4] }
  0x56   :  { %s125_s4 = vpop.sfrf %124 }
  0x57   :  { %p151_p8 = scmp.ne.s32.totalorder %s125_s4, 0 }
  0x59   :  { %129 = shalt.err (%p151_p8)  }
  0x5a   :  { %131 = vsyncmov [#allocation4 + $0x1] }
  0x5d   :  { %s132_s20 = vpop.sfrf %131 }
  0x5e   :  { %p152_p9 = scmp.ne.s32.totalorder %s132_s20, 0 }
  0x60   :  { %136 = shalt.err (%p152_p9)  }

</bundles_post_ra>
